<compile_context>
chip_gen: v6e
topology: v6e:2x2x1
jax: 0.10.0
libtpu: 0.0.40
codegen_flags: <defaults>
</compile_context>

<pallas_src>
import functools

import jax
import jax.numpy as jnp
import numpy as np
from jax.experimental import pallas as pl
from jax.experimental.pallas import tpu as pltpu

_VMEM_LIMIT = 48 * 1024 * 1024  # generous for ~12 MB worst-case budget, < v7x 64 MiB physical


# ---------------------------------------------------------------------------
# Kernel 1: folded head.  cat(rgb, depth) -> Dropout/Conv1x1 x3 collapses
# exactly (eval mode) to:  logits = Wa @ rgb + Wb @ depth + b
# Layout: channels on sublanes, pixels on lanes (native NCHW, free reshape).
# Features arrive as f32 blocks and are cast to the compute dtype in-kernel.
# ---------------------------------------------------------------------------
def head_kernel(rgb_ref, dep_ref, wa_ref, wb_ref, b_ref, logit_ref):
    cdt = wa_ref.dtype
    rgb = rgb_ref[0].astype(cdt)                      # (Cf, P)
    dep = dep_ref[0].astype(cdt)                      # (Cf, P)
    logit_ref[0] = (
        jnp.dot(wa_ref[...], rgb, preferred_element_type=jnp.float32)
        + jnp.dot(wb_ref[...], dep, preferred_element_type=jnp.float32)
        + b_ref[...])                                 # (NC, P) f32


# ---------------------------------------------------------------------------
# Kernel 2: separable bilinear upsample (align_corners=False), per
# (batch, output-row tile), all n_class channels in one block:
#   out[c] (THo, Wo) = Wh_tile (THo, Hf) @ ( X_c (Hf, Wf) @ Ww^T (Wf, Wo) )
# ---------------------------------------------------------------------------
def upsample_kernel(logit_ref, wh_ref, wwt_ref, out_ref, *, n_class):
    wwt = wwt_ref[...]                                # (Wf, Wo) f32
    wh = wh_ref[...]                                  # (THo, Hf) f32
    for c in range(n_class):                          # NC is tiny & static
        tc = jnp.dot(logit_ref[0, c], wwt,
                     preferred_element_type=jnp.float32)             # (Hf, Wo)
        out_ref[0, c] = jnp.dot(wh, tc,
                                preferred_element_type=jnp.float32)  # (THo, Wo)


# ---------------------------------------------------------------------------
# Constant 1-D bilinear interpolation matrices (align_corners=False), numpy.
# ---------------------------------------------------------------------------
def bilinear_matrix_np(in_size, out_size):
    scale = in_size / out_size
    o = np.arange(out_size, dtype=np.float64)
    src = np.maximum((o + 0.5) * scale - 0.5, 0.0)
    i0 = np.minimum(np.floor(src).astype(np.int64), in_size - 1)
    i1 = np.minimum(i0 + 1, in_size - 1)
    lam = src - i0
    m = np.zeros((out_size, in_size), np.float32)
    rows = np.arange(out_size)
    np.add.at(m, (rows, i0), (1.0 - lam).astype(np.float32))
    np.add.at(m, (rows, i1), lam.astype(np.float32))
    return m


def _pick_row_tile(out_h, n_class, out_w, max_block_bytes=4 * 1024 * 1024):
    """Largest multiple-of-8 divisor of out_h whose (n_class, tile, out_w) f32
    block fits the budget; prefer >=2 row tiles so 2-TC chips (v7x) get >=2
    parallel grid steps per batch.  (480 -> 240, 16 -> 8.)"""
    divisors = [d for d in range(8, out_h + 1, 8) if out_h % d == 0]
    if not divisors:
        return out_h                                   # tiny output: one tile
    fitting = [d for d in divisors
               if n_class * d * out_w * 4 <= max_block_bytes] or [min(divisors)]
    split = [d for d in fitting if d < out_h]
    return max(split) if split else max(fitting)


# ---------------------------------------------------------------------------
# Wrapper
# ---------------------------------------------------------------------------
def suction_effnet_fcn_head(rgb_feat_nchw, dep_feat_nchw, params, out_size,
                            compute_dtype=jnp.bfloat16):
    """rgb_feat_nchw / dep_feat_nchw: (B, Cf, Hf, Wf) trunk outputs (NCHW, f32).
    params: (w1 (C2, 2Cf), b1 (C2,), w2 (C4, C2), b2 (C4,), w3 (NC, C4), b3 (NC,))
            = the squeezed PyTorch Conv2d 1x1 weights/biases of self.feature.
    Returns (B, n_class, Ho, Wo) float32 (NCHW), matching the PyTorch module."""
    w1, b1, w2, b2, w3, b3 = params
    B, Cf, Hf, Wf = rgb_feat_nchw.shape
    Ho, Wo = out_size
    P = Hf * Wf
    NC = w3.shape[0]

    # ---- fold Dropout->Conv1x1 x3 offline in f32 (exact in eval mode) ----
    hi = jax.lax.Precision.HIGHEST
    w1f, w2f, w3f = (w.astype(jnp.float32) for w in (w1, w2, w3))
    b1f, b2f, b3f = (b.astype(jnp.float32) for b in (b1, b2, b3))
    w_full = jnp.dot(w3f, jnp.dot(w2f, w1f, precision=hi), precision=hi)  # (NC, 2Cf)
    b_full = (jnp.dot(w3f, jnp.dot(w2f, b1f, precision=hi) + b2f, precision=hi)
              + b3f)                                                      # (NC,)
    wa = w_full[:, :Cf].astype(compute_dtype)      # cat(rgb, depth) fused: split W
    wb = w_full[:, Cf:].astype(compute_dtype)
    bias = b_full.reshape(NC, 1).astype(jnp.float32)

    rgb = rgb_feat_nchw.reshape(B, Cf, P)          # free reshape, stays f32
    dep = dep_feat_nchw.reshape(B, Cf, P)

    # --- kernel 1: per-pixel class logits (B, NC, P), pixels on lanes ---
    # Note: with B == 1 this kernel has a single grid step (one TC on v7x),
    # but after the fold it is a tiny HBM-read-bound stream, so the impact is
    # negligible; the heavy kernel (upsample) always has >= 2*B parallel steps.
    logits = pl.pallas_call(
        head_kernel,
        out_shape=jax.ShapeDtypeStruct((B, NC, P), jnp.float32),
        grid_spec=pltpu.PrefetchScalarGridSpec(
            num_scalar_prefetch=0,
            grid=(B,),
            in_specs=[
                pl.BlockSpec((1, Cf, P), lambda b: (b, 0, 0)),
                pl.BlockSpec((1, Cf, P), lambda b: (b, 0, 0)),
                pl.BlockSpec((NC, Cf), lambda b: (0, 0)),
                pl.BlockSpec((NC, Cf), lambda b: (0, 0)),
                pl.BlockSpec((NC, 1), lambda b: (0, 0)),
            ],
            out_specs=pl.BlockSpec((1, NC, P), lambda b: (b, 0, 0)),
        ),
        compiler_params=pltpu.CompilerParams(
            dimension_semantics=("parallel",),
            vmem_limit_bytes=_VMEM_LIMIT),
    )(rgb, dep, wa, wb, bias)

    # --- kernel 2: separable bilinear upsample, NC folded into the block ---
    wh = jnp.asarray(bilinear_matrix_np(Hf, Ho))       # (Ho, Hf) f32
    wwt = jnp.asarray(bilinear_matrix_np(Wf, Wo).T)    # (Wf, Wo) f32
    logits3 = logits.reshape(B, NC, Hf, Wf)            # free reshape
    tho = _pick_row_tile(Ho, NC, Wo)
    nt = Ho // tho

    out = pl.pallas_call(
        functools.partial(upsample_kernel, n_class=NC),
        out_shape=jax.ShapeDtypeStruct((B, NC, Ho, Wo), jnp.float32),
        grid_spec=pltpu.PrefetchScalarGridSpec(
            num_scalar_prefetch=0,
            grid=(B, nt),
            in_specs=[
                pl.BlockSpec((1, NC, Hf, Wf), lambda b, t: (b, 0, 0, 0)),
                pl.BlockSpec((tho, Hf), lambda b, t: (t, 0)),
                pl.BlockSpec((Wf, Wo), lambda b, t: (0, 0)),
            ],
            out_specs=pl.BlockSpec((1, NC, tho, Wo), lambda b, t: (b, 0, t, 0)),
        ),
        compiler_params=pltpu.CompilerParams(
            dimension_semantics=("parallel", "parallel"),
            vmem_limit_bytes=_VMEM_LIMIT),
    )(logits3, wh, wwt)

    return out


# ---------------------------------------------------------------------------
# Pure-JAX reference of the same eval-mode math (unfolded, for sanity check).
# ---------------------------------------------------------------------------
def reference_forward(rgb_feat, dep_feat, params, out_size):
    w1, b1, w2, b2, w3, b3 = params
    B, Cf, Hf, Wf = rgb_feat.shape
    Ho, Wo = out_size
    hi = jax.lax.Precision.HIGHEST
    x = jnp.concatenate([rgb_feat, dep_feat], axis=1)              # (B, 2Cf, H, W)
    h1 = jnp.einsum('oc,bchw->bohw', w1, x, precision=hi) + b1[None, :, None, None]
    h2 = jnp.einsum('oc,bchw->bohw', w2, h1, precision=hi) + b2[None, :, None, None]
    lg = jnp.einsum('oc,bchw->bohw', w3, h2, precision=hi) + b3[None, :, None, None]
    wh = jnp.asarray(bilinear_matrix_np(Hf, Ho))                   # (Ho, Hf)
    ww = jnp.asarray(bilinear_matrix_np(Wf, Wo))                   # (Wo, Wf)
    return jnp.einsum('oh,bchw,pw->bcop', wh, lg, ww, precision=hi)


if __name__ == "__main__":
    # Small EfficientNet-b0-like (scaled-down) shapes:
    #   per-trunk feature channels Cf=64 (stands in for 1280),
    #   head: 2*Cf -> Cf//2 -> Cf//4 -> n_class, trunk spatial 4x5,
    #   out_size 16x20 (stands in for 480x640).
    B, Cf, Hf, Wf = 2, 64, 4, 5
    NC = 3
    out_size = (16, 20)
    C2, C4 = Cf // 2, Cf // 4

    k = jax.random.split(jax.random.PRNGKey(0), 8)
    rgb_feat = jax.random.normal(k[0], (B, Cf, Hf, Wf), jnp.float32)
    dep_feat = jax.random.normal(k[1], (B, Cf, Hf, Wf), jnp.float32)

    params = (
        0.05 * jax.random.normal(k[2], (C2, 2 * Cf), jnp.float32),  # conv1 W
        0.05 * jax.random.normal(k[3], (C2,), jnp.float32),         # conv1 b
        0.05 * jax.random.normal(k[4], (C4, C2), jnp.float32),      # conv2 W
        0.05 * jax.random.normal(k[5], (C4,), jnp.float32),         # conv2 b
        0.05 * jax.random.normal(k[6], (NC, C4), jnp.float32),      # conv3 W
        0.05 * jax.random.normal(k[7], (NC,), jnp.float32),         # conv3 b
    )

    out_f32 = jax.block_until_ready(
        suction_effnet_fcn_head(rgb_feat, dep_feat, params, out_size,
                                compute_dtype=jnp.float32))
    out_bf16 = jax.block_until_ready(
        suction_effnet_fcn_head(rgb_feat, dep_feat, params, out_size,
                                compute_dtype=jnp.bfloat16))
    ref = jax.block_until_ready(
        reference_forward(rgb_feat, dep_feat, params, out_size))

    assert out_f32.shape == (B, NC) + out_size, out_f32.shape
    assert out_bf16.shape == (B, NC) + out_size, out_bf16.shape
    np.testing.assert_allclose(np.asarray(out_f32), np.asarray(ref),
                               rtol=1e-3, atol=1e-3)
    np.testing.assert_allclose(np.asarray(out_bf16), np.asarray(ref),
                               rtol=2e-2, atol=2e-2)
    print("KERNEL_OK")
</pallas_src>

<mosaic_0001>
module attributes {stable_mosaic.version = 11 : i64} {
  func.func @head_kernel(%arg0: i32, %arg1: memref<1x64x20xf32, #tpu.memory_space<vmem>>, %arg2: memref<1x64x20xf32, #tpu.memory_space<vmem>>, %arg3: memref<3x64xf32, #tpu.memory_space<vmem>>, %arg4: memref<3x64xf32, #tpu.memory_space<vmem>>, %arg5: memref<3x1xf32, #tpu.memory_space<vmem>>, %arg6: memref<1x3x20xf32, #tpu.memory_space<vmem>>) attributes {dimension_semantics = [#tpu.dimension_semantics<parallel>], iteration_bounds = array<i64: 2>, scalar_prefetch = 0 : i64, scratch_operands = 0 : i64, tpu.core_type = #tpu.core_type<tc>, window_params = [{transform_indices = @transform_0, window_bounds = array<i64: 1, 64, 20>}, {transform_indices = @transform_1, window_bounds = array<i64: 1, 64, 20>}, {pipeline_mode = #tpu.pipeline_mode<synchronous>, transform_indices = @transform_2, window_bounds = array<i64: 3, 64>}, {pipeline_mode = #tpu.pipeline_mode<synchronous>, transform_indices = @transform_3, window_bounds = array<i64: 3, 64>}, {pipeline_mode = #tpu.pipeline_mode<synchronous>, transform_indices = @transform_4, window_bounds = array<i64: 3, 1>}, {transform_indices = @transform_5, window_bounds = array<i64: 1, 3, 20>}]} {
    %c0 = arith.constant 0 : index
    %c0_0 = arith.constant 0 : index
    %c0_1 = arith.constant 0 : index
    %0 = vector.load %arg1[%c0, %c0_0, %c0_1] : memref<1x64x20xf32, #tpu.memory_space<vmem>>, vector<1x64x20xf32>
    %1 = vector.shape_cast %0 : vector<1x64x20xf32> to vector<64x20xf32>
    %c0_2 = arith.constant 0 : index
    %c0_3 = arith.constant 0 : index
    %c0_4 = arith.constant 0 : index
    %2 = vector.load %arg2[%c0_2, %c0_3, %c0_4] : memref<1x64x20xf32, #tpu.memory_space<vmem>>, vector<1x64x20xf32>
    %3 = vector.shape_cast %2 : vector<1x64x20xf32> to vector<64x20xf32>
    %c0_5 = arith.constant 0 : index
    %c0_6 = arith.constant 0 : index
    %4 = vector.load %arg3[%c0_5, %c0_6] : memref<3x64xf32, #tpu.memory_space<vmem>>, vector<3x64xf32>
    %cst = arith.constant dense<0.000000e+00> : vector<3x20xf32>
    %5 = tpu.matmul %4, %1, %cst {dimension_numbers = #tpu.dot_dimension_numbers<[1], [0], [0], [1], [0, 0, 1, 1], [], []>} : vector<3x64xf32>, vector<64x20xf32>, vector<3x20xf32> -> vector<3x20xf32>
    %c0_7 = arith.constant 0 : index
    %c0_8 = arith.constant 0 : index
    %6 = vector.load %arg4[%c0_7, %c0_8] : memref<3x64xf32, #tpu.memory_space<vmem>>, vector<3x64xf32>
    %cst_9 = arith.constant dense<0.000000e+00> : vector<3x20xf32>
    %7 = tpu.matmul %6, %3, %cst_9 {dimension_numbers = #tpu.dot_dimension_numbers<[1], [0], [0], [1], [0, 0, 1, 1], [], []>} : vector<3x64xf32>, vector<64x20xf32>, vector<3x20xf32> -> vector<3x20xf32>
    %8 = arith.addf %5, %7 : vector<3x20xf32>
    %c0_10 = arith.constant 0 : index
    %c0_11 = arith.constant 0 : index
    %9 = vector.load %arg5[%c0_10, %c0_11] : memref<3x1xf32, #tpu.memory_space<vmem>>, vector<3x1xf32>
    %10 = vector.broadcast %9 : vector<3x1xf32> to vector<3x20xf32>
    %11 = arith.addf %8, %10 : vector<3x20xf32>
    %c0_12 = arith.constant 0 : index
    %c0_13 = arith.constant 0 : index
    %c0_14 = arith.constant 0 : index
    %12 = vector.load %arg6[%c0_12, %c0_13, %c0_14] : memref<1x3x20xf32, #tpu.memory_space<vmem>>, vector<1x3x20xf32>
    %13 = vector.shape_cast %12 : vector<1x3x20xf32> to vector<3x20xf32>
    %14 = vector.shape_cast %11 : vector<3x20xf32> to vector<1x3x20xf32>
    tpu.vector_store %arg6[%c0_12, %c0_13, %c0_14], %14 {strides = array<i32>} : memref<1x3x20xf32, #tpu.memory_space<vmem>>, vector<1x3x20xf32>,
    return
  }
  func.func @transform_0(%arg0: i32) -> (i32, i32, i32) {
    %c0_i32 = arith.constant 0 : i32
    %c0_i32_0 = arith.constant 0 : i32
    %c0_i32_1 = arith.constant 0 : i32
    return %arg0, %c0_i32, %c0_i32_0 : i32, i32, i32
  }
  func.func @transform_1(%arg0: i32) -> (i32, i32, i32) {
    %c0_i32 = arith.constant 0 : i32
    %c0_i32_0 = arith.constant 0 : i32
    %c0_i32_1 = arith.constant 0 : i32
    return %arg0, %c0_i32, %c0_i32_0 : i32, i32, i32
  }
  func.func @transform_2(%arg0: i32) -> (i32, i32) {
    %c0_i32 = arith.constant 0 : i32
    %c0_i32_0 = arith.constant 0 : i32
    %c0_i32_1 = arith.constant 0 : i32
    return %c0_i32, %c0_i32_0 : i32, i32
  }
  func.func @transform_3(%arg0: i32) -> (i32, i32) {
    %c0_i32 = arith.constant 0 : i32
    %c0_i32_0 = arith.constant 0 : i32
    %c0_i32_1 = arith.constant 0 : i32
    return %c0_i32, %c0_i32_0 : i32, i32
  }
  func.func @transform_4(%arg0: i32) -> (i32, i32) {
    %c0_i32 = arith.constant 0 : i32
    %c0_i32_0 = arith.constant 0 : i32
    %c0_i32_1 = arith.constant 0 : i32
    return %c0_i32, %c0_i32_0 : i32, i32
  }
  func.func @transform_5(%arg0: i32) -> (i32, i32, i32) {
    %c0_i32 = arith.constant 0 : i32
    %c0_i32_0 = arith.constant 0 : i32
    %c0_i32_1 = arith.constant 0 : i32
    return %arg0, %c0_i32, %c0_i32_0 : i32, i32, i32
  }
}

</mosaic_0001>

<bundles_post_ra>
// kernel: tpu_custom_call.1
= control target key start
LH: loop header
LB: loop body
LE: loop exit
PB: predicated region body
PF: predicated region fallthrough
CT: control target
= control target key end

     0   :  { %s607_s18 = smov 0   ;;  %s660_s0 = inlined_call_operand.vmem [shape: f32[2,64,20], index: 0, kind: input, shape index: {}]   ;;  %s661_s1 = inlined_call_operand.vmem [shape: f32[2,64,20], index: 1, kind: input, shape index: {}]   ;;  %s662_s2 = inlined_call_operand.vmem [shape: f32[3,64], index: 2, kind: input, shape index: {}]   ;;  %s663_s3 = inlined_call_operand.vmem [shape: f32[3,64], index: 3, kind: input, shape index: {}]   ;;  %s664_s4 = inlined_call_operand.vmem [shape: f32[3,1], index: 4, kind: input, shape index: {}]   ;;  %s665_s5 = inlined_call_operand.vmem [shape: f32[2,3,20], index: 5, kind: output, shape index: {}]  }
   0x1 LB: > { %s482_s19 = sadd.s32 4294967295, %s572_s18   ;;  %p486_p0 = scmp.ge.s32.totalorder %s572_s18, 1  ;;  %s572_s18 = sphi %s607_s18, %s15_s18  }
   0x2   : > { %p197_p1 = scmp.lt.s32.totalorder %s572_s18, 3 }
   0x4   : > { %p198_p2 = pnand %p486_p0, %p197_p1 }
   0x5   : > { %p229_p3 = scmp.lt.s32.totalorder (!%p198_p2), %s482_s19, 1 }
   0x6   : > { %201 = sbr.rel (%p198_p2) target bundleno = 229 (0xe5), region = 40 }
   0xb   : > { %v574_v0 = vmov 0.0   ;;  %v408_v1 = vld [vmem:[%s664_s4] sm:$0x7]  ;;  %s667_s19 = smov (!%p229_p3, %s482_s19), 1  ;;  %vm575_vm0 = vmmov 0   ;;  %v576_v2 = vmov 0  }
   0xc   : > { %516 = vmatprep.subr.mxu0 %v574_v0  ;;  %535 = vmatprep.subr.mxu1 %v574_v0  ;;  %s496_s22 = sshll.u32 %s667_s19, 6  ;;  %v260_v19 = vld [vmem:[%s663_s3] sm:$0x7]  ;;  %vm261_vm1 = vcmask 523264   ;;  %s491_s8 = sshll.u32 %s667_s19, 2  ;;  %vm415_vm2 = vcmask 157696  }
   0xd   : > { %532 = vmatprep.mubr.msk.f32.mxu0 %vm575_vm0, %v574_v0  ;;  %551 = vmatprep.mubr.msk.f32.mxu1 %vm575_vm0, %v574_v0  ;;  %s624_s25 = scalar_lea.vmem %s661_s1, %s496_s22  ;;  %s629_s28 = scalar_lea.vmem %s660_s0, %s496_s22  ;;  %v259_v20 = vld [vmem:[%s662_s2] sm:$0x7] }
   0xe   : > { %565 = vset.pattern.permute.xlu0 %v576_v2  ;;  %v258_v3 = vld [vmem:[%s624_s25 + $0x38] sm:$0xff]  ;;  %v257_v5 = vld [vmem:[%s624_s25 + $0x30] sm:$0xff]  ;;  %v256_v7 = vld [vmem:[%s624_s25 + $0x28] sm:$0xff]  ;;  %s242_s11 = scalar_lea.vmem %s665_s5, %s491_s8 }
   0xf   : > { %411 = vperm.xlu0 %565, %v408_v1   ;;  %v250_v4 = vld [vmem:[%s629_s28 + $0x38] sm:$0xff]  ;;  %517 = vmatpush3.msra.mxu0 %v258_v3  ;;  %v249_v6 = vld [vmem:[%s629_s28 + $0x30] sm:$0xff]  ;;  %v248_v8 = vld [vmem:[%s629_s28 + $0x28] sm:$0xff] }
  0x10   : > { %536 = vmatpush3.msra.mxu1 %v250_v4  ;;  %518 = vmatprep.subr.mxu0 %v574_v0  ;;  %v255_v9 = vld [vmem:[%s624_s25 + $0x20] sm:$0xff]  ;;  %v254_v11 = vld [vmem:[%s624_s25 + $0x18] sm:$0xff]  ;;  %v253_v13 = vld [vmem:[%s624_s25 + $0x10] sm:$0xff] }
  0x11   : > { %537 = vmatprep.subr.mxu1 %v574_v0  ;;  %519 = vmatpush3.msra.mxu0 %v257_v5  ;;  %v247_v10 = vld [vmem:[%s629_s28 + $0x20] sm:$0xff]  ;;  %v246_v12 = vld [vmem:[%s629_s28 + $0x18] sm:$0xff]  ;;  %v245_v14 = vld [vmem:[%s629_s28 + $0x10] sm:$0xff] }
  0x12   : > { %538 = vmatpush3.msra.mxu1 %v249_v6  ;;  %520 = vmatprep.subr.mxu0 %v574_v0  ;;  %v252_v15 = vld [vmem:[%s624_s25 + $0x8] sm:$0xff]  ;;  %v251_v17 = vld [vmem:[%s624_s25] sm:$0xff] }
  0x13   : > { %539 = vmatprep.subr.mxu1 %v574_v0  ;;  %521 = vmatpush3.msra.mxu0 %v256_v7  ;;  %v244_v16 = vld [vmem:[%s629_s28 + $0x8] sm:$0xff]  ;;  %v243_v18 = vld [vmem:[%s629_s28] sm:$0xff] }
  0x14   : > { %540 = vmatpush3.msra.mxu1 %v248_v8  ;;  %522 = vmatprep.subr.mxu0 %v574_v0 }
  0x15   : > { %541 = vmatprep.subr.mxu1 %v574_v0  ;;  %523 = vmatpush3.msra.mxu0 %v255_v9 }
  0x16   : > { %542 = vmatpush3.msra.mxu1 %v247_v10  ;;  %524 = vmatprep.subr.mxu0 %v574_v0 }
  0x17   : > { %543 = vmatprep.subr.mxu1 %v574_v0  ;;  %525 = vmatpush3.msra.mxu0 %v254_v11 }
  0x18   : > { %544 = vmatpush3.msra.mxu1 %v246_v12  ;;  %526 = vmatprep.subr.mxu0 %v574_v0 }
  0x19   : > { %545 = vmatprep.subr.mxu1 %v574_v0  ;;  %527 = vmatpush3.msra.mxu0 %v253_v13 }
  0x1a   : > { %546 = vmatpush3.msra.mxu1 %v245_v14  ;;  %528 = vmatprep.subr.mxu0 %v574_v0 }
  0x1b   : > { %547 = vmatprep.subr.mxu1 %v574_v0  ;;  %529 = vmatpush3.msra.mxu0 %v252_v15 }
  0x1c   : > { %548 = vmatpush3.msra.mxu1 %v244_v16  ;;  %530 = vmatprep.subr.mxu0 %v574_v0 }
  0x1d   : > { %549 = vmatprep.subr.mxu1 %v574_v0  ;;  %531 = vmatpush3.msra.mxu0 %v251_v17 }
  0x1e   : > { %550 = vmatpush3.msra.mxu1 %v243_v18  ;;  %533 = vmatmul.mubr.msk.f32.vlgmr.msra.gmra.mxu0 %vm261_vm1, %v260_v19 }
  0x1f   : > { %552 = vmatmul.mubr.msk.f32.vlgmr.msra.gmra.mxu1 %vm261_vm1, %v259_v20 }
  0x8a   : > { %v412_v21 = vpop.permute.xlu0 %411 }
  0xde   : > { %v331_v22 = vpop.f32.mrf.mxu0 }
  0xdf   : > { %v404_v23 = vpop.f32.mrf.mxu1 }
  0xe0   : > { %v405_v24 = vadd.f32 %v404_v23, %v331_v22  ;;  %v534_v25 = vpop.f32.mrf.mxu0 }
  0xe1   : > { %v553_v26 = vpop.f32.mrf.mxu1 }
  0xe2   : > { %v414_v27 = vadd.f32 %v412_v21, %v405_v24 }
  0xe4   : > { %416 = vst.msk [vmem:[%s242_s11] sm:$0x7] %vm415_vm2, %v414_v27 }
  0xe5 PF: > { %s15_s18 = sadd.s32 1, %s572_s18  }
  0xe6   : > { %p12_p4 = scmp.ge.s32.totalorder %s15_s18, 4  }
  0xe8   :  { %14 = sbr.rel (!%p12_p4) target bundleno = 1 (0x1), region = 73 }

</bundles_post_ra>
